<compile_context>
chip_gen: v7x
topology: tpu7x:2x2x1
jax: 0.10.0
libtpu: 0.0.40
codegen_flags: <defaults>
</compile_context>

<pallas_src>
import jax
import jax.numpy as jnp
from jax.experimental import pallas as pl
from jax.experimental.pallas import tpu as pltpu


_LANE = 128
_SUBLANE = 8


def _round_up(x, m):
    return ((x + m - 1) // m) * m


def _vmem_capacity_bytes():
    """Per-core VMEM capacity, with a v7x-conservative fallback."""
    cap = 64 << 20
    try:
        info = pltpu.get_tpu_info()
        cap = int(getattr(info, "vmem_capacity_bytes", cap))
    except Exception:  # older jax / interpret mode / query unavailable
        pass
    return max(32 << 20, min(cap, 128 << 20))


def _usage_bytes(tm, tk, tn, itemsize, with_acc):
    # Double-buffered x, w, bias and out tiles (+ resident f32 accumulator when K is blocked).
    u = (2 * tm * tk + 2 * tk * tn + 2 * tn + 2 * tm * tn) * itemsize
    if with_acc:
        u += tm * tn * 4
    return u


def _choose_plan(B, F, C, itemsize):
    """Pick tiles.  Returns (tm, tk, tn, Kp, k_blocked, vmem_limit_bytes)."""
    cap = _vmem_capacity_bytes()
    budget = cap // 2            # headroom for compiler-internal scratch / pipelining
    vmem_limit = (cap * 3) // 4

    Mp = _round_up(B, _SUBLANE)  # M tail handled by cdiv grid + masked stores (no pad)
    Np = _round_up(C, _LANE)     # N tail handled the same way (no pad)

    tm_cands = (512, 256, 128, 64, 32, 16, 8)

    # Pass 1: whole weight resident along N and K (grid_n == 1, single K step):
    # the weight is DMA'd exactly once and x exactly once -> minimal HBM traffic.
    for tm in (512, 256, 128):
        tm = min(tm, Mp)
        if _usage_bytes(tm, F, Np, itemsize, with_acc=False) <= budget:
            return tm, F, Np, F, False, vmem_limit

    # Pass 2: N-blocked but still a single K step (no accumulator, no K padding).
    for tm in tm_cands:
        tm = min(tm, Mp)
        for tn in (512, 256, 128):
            tn = min(tn, Np)
            if _usage_bytes(tm, F, tn, itemsize, with_acc=False) <= budget:
                return tm, F, tn, F, False, vmem_limit

    # Pass 3 (very large in_features): block K.  K is zero-padded to a multiple of 128 and
    # tk is an exact divisor of the padded K, so no garbage ever enters the reduction.
    Kp = _round_up(F, _LANE)
    for tm in tm_cands:
        tm = min(tm, Mp)
        for tn in (512, 256, 128):
            tn = min(tn, Np)
            tk_max = min(Kp, 4096)
            for tk in range(tk_max, 0, -_LANE):
                if Kp % tk == 0 and _usage_bytes(tm, tk, tn, itemsize, with_acc=True) <= budget:
                    return tm, tk, tn, Kp, True, vmem_limit

    raise ValueError(f"could not find a VMEM-feasible tiling for B={B}, F={F}, C={C}")


def _linear_kernel_single_k(x_ref, w_ref, b_ref, o_ref):
    # x: (tm, K), w: (K, tn), b: (1, tn), o: (tm, tn).  Whole contraction in one MXU pass;
    # no accumulator scratch needed.
    acc = jnp.dot(x_ref[...], w_ref[...], preferred_element_type=jnp.float32)
    o_ref[...] = (acc + b_ref[...]).astype(o_ref.dtype)


def _linear_kernel_k_blocked(x_ref, w_ref, b_ref, o_ref, acc_ref):
    # x: (tm, tk), w: (tk, tn), b: (1, tn), o/acc: (tm, tn).  K is the last ("arbitrary")
    # grid axis; the f32 accumulator stays resident in VMEM across K steps.
    k = pl.program_id(2)

    @pl.when(k == 0)
    def _():
        acc_ref[...] = jnp.zeros_like(acc_ref)

    acc_ref[...] += jnp.dot(x_ref[...], w_ref[...], preferred_element_type=jnp.float32)

    @pl.when(k == pl.num_programs(2) - 1)
    def _():
        o_ref[...] = (acc_ref[...] + b_ref[...]).astype(o_ref.dtype)


@jax.jit
def mlp_forward(x, weight, bias):
    """Pallas equivalent of torch.nn.Linear(in_channels, num_classes)(x).

    x:      (B, in_features)
    weight: (num_classes, in_features)   -- PyTorch layout
    bias:   (num_classes,)
    returns (B, num_classes)
    """
    B, F = x.shape
    C = weight.shape[0]
    itemsize = max(jnp.dtype(x.dtype).itemsize, jnp.dtype(weight.dtype).itemsize)

    tm, tk, tn, Kp, k_blocked, vmem_limit = _choose_plan(B, F, C, itemsize)

    # (C, F) -> (F, C): MXU-friendly (K on sublanes, lane-dense N) so the kernel is a plain
    # matmul with no per-tile transpose.  This is the only copy of the weight and it fuses
    # with the K-pad copy whenever that pad is needed.
    # TODO(synk): accept a pre-transposed (F, C) weight to skip even this small copy on reuse.
    w_t = weight.T
    b2 = bias.reshape(1, C)

    if Kp != F:
        # Only reached on the K-blocked fallback: zero-pad K so padded columns contribute 0.
        x = jnp.pad(x, ((0, 0), (0, Kp - F)))
        w_t = jnp.pad(w_t, ((0, Kp - F), (0, 0)))

    grid_m = pl.cdiv(B, tm)
    grid_n = pl.cdiv(C, tn)
    out_shape = jax.ShapeDtypeStruct((B, C), x.dtype)

    if not k_blocked:
        # NOTE(v7x): if a profile ever shows one idle TensorCore, flip the M axis to
        # pltpu.CORE_PARALLEL; plain "parallel" is kept here since it is safe on all gens.
        grid_spec = pltpu.PrefetchScalarGridSpec(
            num_scalar_prefetch=0,
            grid=(grid_m, grid_n),
            in_specs=[
                pl.BlockSpec((tm, tk), lambda i, j: (i, 0)),   # x (block constant in j)
                pl.BlockSpec((tk, tn), lambda i, j: (0, j)),   # weight (constant if grid_n==1)
                pl.BlockSpec((1, tn), lambda i, j: (0, j)),    # bias
            ],
            out_specs=pl.BlockSpec((tm, tn), lambda i, j: (i, j)),
        )
        kernel = _linear_kernel_single_k
        dims = ("parallel", "parallel")
    else:
        grid_spec = pltpu.PrefetchScalarGridSpec(
            num_scalar_prefetch=0,
            grid=(grid_m, grid_n, Kp // tk),
            in_specs=[
                pl.BlockSpec((tm, tk), lambda i, j, k: (i, k)),   # x
                pl.BlockSpec((tk, tn), lambda i, j, k: (k, j)),   # weight (K, N)
                pl.BlockSpec((1, tn), lambda i, j, k: (0, j)),    # bias
            ],
            out_specs=pl.BlockSpec((tm, tn), lambda i, j, k: (i, j)),
            scratch_shapes=[pltpu.VMEM((tm, tn), jnp.float32)],
        )
        kernel = _linear_kernel_k_blocked
        dims = ("parallel", "parallel", "arbitrary")

    return pl.pallas_call(
        kernel,
        out_shape=out_shape,
        grid_spec=grid_spec,
        compiler_params=pltpu.CompilerParams(
            dimension_semantics=dims,
            vmem_limit_bytes=int(vmem_limit),
        ),
    )(x, w_t, b2)


if __name__ == "__main__":
    # Deterministic, synthetic parameters (mirrors nn.Linear(in_channels, num_classes)).
    in_channels = 32
    num_classes = 16
    batch = 8

    key = jax.random.PRNGKey(0)
    kx, kw, kb = jax.random.split(key, 3)

    bound = 1.0 / jnp.sqrt(in_channels)
    weight = jax.random.uniform(
        kw, (num_classes, in_channels), jnp.float32, minval=-bound, maxval=bound
    )
    bias = jax.random.uniform(
        kb, (num_classes,), jnp.float32, minval=-bound, maxval=bound
    )
    x = jax.random.normal(kx, (batch, in_channels), jnp.float32)

    out = mlp_forward(x, weight, bias)
    out = jax.block_until_ready(out)

    # Sanity check against a plain-JAX reference of the same linear layer.
    ref = x @ weight.T + bias
    assert out.shape == (batch, num_classes)
    assert jnp.allclose(out, ref, atol=1e-5, rtol=1e-5)

    print("KERNEL_OK")
</pallas_src>

<mosaic_0001>
module attributes {stable_mosaic.version = 11 : i64} {
  func.func @_linear_kernel_single_k(%arg0: i32, %arg1: i32, %arg2: memref<8x32xf32, #tpu.memory_space<vmem>>, %arg3: memref<32x128xf32, #tpu.memory_space<vmem>>, %arg4: memref<1x128xf32, #tpu.memory_space<vmem>>, %arg5: memref<8x128xf32, #tpu.memory_space<vmem>>) attributes {dimension_semantics = [#tpu.dimension_semantics<parallel>, #tpu.dimension_semantics<parallel>], iteration_bounds = array<i64: 1, 1>, scalar_prefetch = 0 : i64, scratch_operands = 0 : i64, tpu.core_type = #tpu.core_type<tc>, window_params = [{transform_indices = @transform_0, window_bounds = array<i64: 8, 32>}, {transform_indices = @transform_1, window_bounds = array<i64: 32, 128>}, {transform_indices = @transform_2, window_bounds = array<i64: 1, 128>}, {transform_indices = @transform_3, window_bounds = array<i64: 8, 128>}]} {
    %c0 = arith.constant 0 : index
    %c0_0 = arith.constant 0 : index
    %0 = vector.load %arg2[%c0, %c0_0] : memref<8x32xf32, #tpu.memory_space<vmem>>, vector<8x32xf32>
    %c0_1 = arith.constant 0 : index
    %c0_2 = arith.constant 0 : index
    %1 = vector.load %arg3[%c0_1, %c0_2] : memref<32x128xf32, #tpu.memory_space<vmem>>, vector<32x128xf32>
    %cst = arith.constant dense<0.000000e+00> : vector<8x128xf32>
    %2 = tpu.matmul %0, %1, %cst {dimension_numbers = #tpu.dot_dimension_numbers<[1], [0], [0], [1], [0, 0, 1, 1], [], []>} : vector<8x32xf32>, vector<32x128xf32>, vector<8x128xf32> -> vector<8x128xf32>
    %c0_3 = arith.constant 0 : index
    %c0_4 = arith.constant 0 : index
    %3 = vector.load %arg4[%c0_3, %c0_4] : memref<1x128xf32, #tpu.memory_space<vmem>>, vector<1x128xf32>
    %4 = vector.broadcast %3 : vector<1x128xf32> to vector<8x128xf32>
    %5 = arith.addf %2, %4 : vector<8x128xf32>
    %c0_5 = arith.constant 0 : index
    %c0_6 = arith.constant 0 : index
    %6 = vector.load %arg5[%c0_5, %c0_6] : memref<8x128xf32, #tpu.memory_space<vmem>>, vector<8x128xf32>
    tpu.vector_store %arg5[%c0_5, %c0_6], %5 {strides = array<i32>} : memref<8x128xf32, #tpu.memory_space<vmem>>, vector<8x128xf32>,
    return
  }
  func.func @transform_0(%arg0: i32, %arg1: i32) -> (i32, i32) {
    %c0_i32 = arith.constant 0 : i32
    %c0_i32_0 = arith.constant 0 : i32
    return %arg0, %c0_i32 : i32, i32
  }
  func.func @transform_1(%arg0: i32, %arg1: i32) -> (i32, i32) {
    %c0_i32 = arith.constant 0 : i32
    %c0_i32_0 = arith.constant 0 : i32
    return %c0_i32, %arg1 : i32, i32
  }
  func.func @transform_2(%arg0: i32, %arg1: i32) -> (i32, i32) {
    %c0_i32 = arith.constant 0 : i32
    %c0_i32_0 = arith.constant 0 : i32
    return %c0_i32, %arg1 : i32, i32
  }
  func.func @transform_3(%arg0: i32, %arg1: i32) -> (i32, i32) {
    %c0_i32 = arith.constant 0 : i32
    return %arg0, %arg1 : i32, i32
  }
}

</mosaic_0001>

<bundles_post_ra>
// kernel: mlp_forward.1
= control target key start
LH: loop header
LB: loop body
LE: loop exit
PB: predicated region body
PF: predicated region fallthrough
CT: control target
= control target key end

     0   :  { %v168_v3 = vmov 0.0|0.0   ;;  %vm169_vm0 = vmmov 0   ;;  %v170_v6 = vmov 0.0   ;;  %s222_s0 = inlined_call_operand.vmem [shape: f32[8,32], index: 0, kind: input, shape index: {}]   ;;  %s223_s1 = inlined_call_operand.vmem [shape: f32[32,16], index: 1, kind: input, shape index: {}]   ;;  %s224_s2 = inlined_call_operand.vmem [shape: f32[1,16], index: 2, kind: input, shape index: {}]   ;;  %s225_s3 = inlined_call_operand.hbm [shape: f32[8,16], index: 3, kind: output, shape index: {}]  }
   0x1   :  { %v16_v0 = vld [vmem:[%s223_s1] sm:$0xff]  ;;  %v17_v1 = vld [vmem:[%s223_s1 + $0x8] sm:$0xff]  ;;  %v18_v2 = vld [vmem:[%s223_s1 + $0x10] sm:$0xff]  ;;  %134 = vmatprep.subr.bf16.mxu0 %v168_v3  ;;  %131 = vmatprep.mubr.msk.f32.mxu0 %vm169_vm0, %v170_v6 }
   0x2   :  { %v135_v4 = vpack.c.bf16 %v17_v1, %v16_v0  ;;  %v19_v5 = vld [vmem:[%s223_s1 + $0x18] sm:$0xff] }
   0x3   :  { %8 = vsyncpa [#allocation3], 0  ;;  %v138_v7 = vpack.c.bf16 %v19_v5, %v18_v2  ;;  %v15_v8 = vld [vmem:[%s222_s0] sm:$0xff]  ;;  %vm27_vm1 = vcmask 261120   ;;  %s171_s24 = smov [#allocation2]  }
   0x4   :  { %136 = vmatpush3.bf16.msra.mxu0 %v135_v4  ;;  %v116_v9 = vld [vmem:[%s224_s2] ss:$0 sm:$0xff]  ;;  %s108_s1 = sshll.u32 %s171_s24, 4  ;;  %s109_s1 = int_to_ptr.vmem [resolvable:$true] %s108_s1 }
   0x5   :  { %137 = vmatprep.subr.bf16.mxu0 %v168_v3  ;;  %s144_s25 = scalar_lea.vmem %s109_s1, 128  ;;  %p149_p1 = scmp.lt.s32.totalorder %s109_s1, %s109_s1 }
   0x6   :  { %p145_p0 = scmp.ne.s32.totalorder %s109_s1, %s144_s25  ;;  %p150_p2 = scmp.lt.s32.totalorder %s144_s25, %s144_s25 }
   0x8   :  { %139 = vmatpush3.bf16.msra.mxu0 %v138_v7  ;;  %p151_p3 = por %p150_p2, %p149_p1 }
   0xa   :  { %p152_p4 = pnand %p151_p3, %p145_p0 }
   0xb   :  { %132 = vmatmul.mubr.msk.f32.vlgmr.msra.gmra.mrb[0].mxu0 %vm27_vm1, %v15_v8 }
  0xde   :  { %v97_v10 = vpop.f32.mrb[0].mxu0 }
  0xdf   :  { %v98_v11 = vadd.f32 %v116_v9, %v97_v10  ;;  %v133_v12 = vpop.f32.mrb[1].mxu0 }
  0xe1   :  { %101 = vst [vmem:[#allocation2] sm:$0xff] %v98_v11 }
  0xe2   :  { %155 = shalt.err (!%p152_p4)
}
  0xe3   :  { %s156_s27 = scalar_lea.hbm %s225_s3, 128 }
  0xe4   :  { %p157_p5 = scmp.ne.s32.totalorder %s225_s3, %s156_s27  ;;  %p160_p6 = scmp.lt.u32.totalorder %s156_s27, %s225_s3 }
  0xe6   :  { %p162_p7 = pnand %p160_p6, %p157_p5 }
  0xe8   :  { %165 = shalt.err (!%p162_p7)
}
  0xe9   :  { %111 = dma.vmem_to_hbm [thread:$0]  %s109_s1, 128, %s225_s3, [#allocation3]  }
  0xea   :  { %166 = dma.done.wait [#allocation3], 128  }
  0xeb   :  { %167 = vsyncadd [#allocation3], 4294967168 }
  0xec   :  { %115 = vsyncpa [#allocation3], 1 }

</bundles_post_ra>
